<compile_context>
chip_gen: v7x
topology: tpu7x:2x2x1
jax: 0.10.0
libtpu: 0.0.40
codegen_flags: <defaults>
</compile_context>

<pallas_src>
import jax
import jax.numpy as jnp
from jax.experimental import pallas as pl
from jax.experimental.pallas import tpu as pltpu


def _round_up(x, m):
    return ((x + m - 1) // m) * m


def _dynamics_kernel(x_ref, w1_ref, b1_ref, w2_ref, b2_ref, w3_ref, b3_ref,
                     out_ref):
    # Layer 1: fused state_net + action_net (block-diagonal W1).
    # x_ref / w*_ref are bf16; accumulate in f32 on the MXU.
    h = jnp.dot(x_ref[...], w1_ref[...], preferred_element_type=jnp.float32)
    h = jnp.maximum(h + b1_ref[...], 0.0)            # f32 bias + ReLU (VPU)

    # Layer 2: Linear(hidden, hidden) + ReLU.
    h = jnp.dot(h.astype(jnp.bfloat16), w2_ref[...],
                preferred_element_type=jnp.float32)
    h = jnp.maximum(h + b2_ref[...], 0.0)

    # Layer 3: Linear(hidden, state_dim), output padded to lane-dense width.
    out_ref[...] = (jnp.dot(h.astype(jnp.bfloat16), w3_ref[...],
                            preferred_element_type=jnp.float32)
                    + b3_ref[...])


def dynamics_forward(state, action, params, *, max_tile=512):
    """state: [B, state_dim*n_history], action: [B, action_dim*2] -> [B, state_dim]."""
    B = state.shape[0]
    in_s, h2 = params["w1s"].shape
    in_a = params["w1a"].shape[0]
    hidden = params["w2"].shape[0]
    state_dim = params["w3"].shape[1]
    in_total = in_s + in_a
    out_pad = _round_up(state_dim, 128)

    # ---- parameter packing (cheap one-time XLA ops) ----
    # Block-diagonal W1 fuses the two layer-1 matmuls into one MXU push.
    w1 = jnp.zeros((in_total, hidden), jnp.float32)
    w1 = w1.at[:in_s, :h2].set(params["w1s"])
    w1 = w1.at[in_s:, h2:].set(params["w1a"])
    b1 = jnp.concatenate([params["b1s"], params["b1a"]], -1).reshape(1, hidden)
    b2 = params["b2"].reshape(1, hidden)
    # Lane-dense output: pad W3/b3 to a 128-multiple width with zeros.
    w3 = jnp.zeros((hidden, out_pad), jnp.float32).at[:, :state_dim].set(params["w3"])
    b3 = jnp.zeros((1, out_pad), jnp.float32).at[:, :state_dim].set(params["b3"])

    # bf16 matmul operands (f32 accumulation requested in-kernel).
    w1 = w1.astype(jnp.bfloat16)
    w2 = params["w2"].astype(jnp.bfloat16)
    w3 = w3.astype(jnp.bfloat16)

    # ---- batch tiling (pad B to a multiple of the tile; slice back after) ----
    tm = min(max_tile, _round_up(B, 16))          # 16: bf16 sublane packing
    b_pad = _round_up(B, tm)
    x = jnp.concatenate([state, action], axis=-1).astype(jnp.bfloat16)
    if b_pad != B:
        x = jnp.pad(x, ((0, b_pad - B), (0, 0)))
    grid = (b_pad // tm,)

    flops = 2 * b_pad * (in_total * hidden + hidden * hidden + hidden * out_pad)
    bytes_accessed = (x.size * 2
                      + (w1.size + w2.size + w3.size) * 2
                      + (b1.size + b2.size + b3.size) * 4
                      + b_pad * out_pad * 4)

    out = pl.pallas_call(
        _dynamics_kernel,
        out_shape=jax.ShapeDtypeStruct((b_pad, out_pad), jnp.float32),
        grid=grid,
        in_specs=[
            pl.BlockSpec((tm, in_total), lambda i: (i, 0)),       # x tile
            pl.BlockSpec((in_total, hidden), lambda i: (0, 0)),   # W1 (resident)
            pl.BlockSpec((1, hidden), lambda i: (0, 0)),          # b1
            pl.BlockSpec((hidden, hidden), lambda i: (0, 0)),     # W2
            pl.BlockSpec((1, hidden), lambda i: (0, 0)),          # b2
            pl.BlockSpec((hidden, out_pad), lambda i: (0, 0)),    # W3 (padded)
            pl.BlockSpec((1, out_pad), lambda i: (0, 0)),         # b3 (padded)
        ],
        out_specs=pl.BlockSpec((tm, out_pad), lambda i: (i, 0)),
        compiler_params=pltpu.CompilerParams(
            dimension_semantics=("parallel",),
            vmem_limit_bytes=32 * 1024 * 1024),
        cost_estimate=pl.CostEstimate(
            flops=flops, transcendentals=0, bytes_accessed=bytes_accessed),
    )(x, w1, b1, w2, b2, w3, b3)

    return out[:B, :state_dim]


def init_params(key, state_dim, action_dim, n_history, hidden_dim):
    """Deterministic synthetic init matching the DNN branch's layer shapes."""
    h2 = hidden_dim // 2
    in_s = state_dim * n_history
    in_a = action_dim * 2
    ks = jax.random.split(key, 8)

    def lin_w(k, fan_in, fan_out):
        scale = 1.0 / jnp.sqrt(jnp.float32(fan_in))
        return jax.random.uniform(k, (fan_in, fan_out), jnp.float32, -scale, scale)

    return {
        "w1s": lin_w(ks[0], in_s, h2),
        "b1s": jax.random.uniform(ks[1], (h2,), jnp.float32, -0.05, 0.05),
        "w1a": lin_w(ks[2], in_a, h2),
        "b1a": jax.random.uniform(ks[3], (h2,), jnp.float32, -0.05, 0.05),
        "w2": lin_w(ks[4], hidden_dim, hidden_dim),
        "b2": jax.random.uniform(ks[5], (hidden_dim,), jnp.float32, -0.05, 0.05),
        "w3": lin_w(ks[6], hidden_dim, state_dim),
        "b3": jax.random.uniform(ks[7], (state_dim,), jnp.float32, -0.05, 0.05),
    }


def reference_forward(state, action, params):
    """Pure-JAX f32 reference matching the PyTorch module (dropout in eval)."""
    h_s = jnp.maximum(state @ params["w1s"] + params["b1s"], 0.0)
    h_a = jnp.maximum(action @ params["w1a"] + params["b1a"], 0.0)
    z = jnp.concatenate([h_s, h_a], axis=-1)
    h = jnp.maximum(z @ params["w2"] + params["b2"], 0.0)
    return h @ params["w3"] + params["b3"]


if __name__ == "__main__":
    # Small config consistent with the module's forward:
    #   state input  : [B, state_dim * n_history]
    #   action input : [B, action_dim * 2]
    #   output       : [B, state_dim]
    state_dim, action_dim, n_history, hidden_dim, batch = 8, 4, 2, 32, 2

    key = jax.random.PRNGKey(0)
    k_p, k_s, k_a = jax.random.split(key, 3)
    params = init_params(k_p, state_dim, action_dim, n_history, hidden_dim)

    state = jax.random.normal(k_s, (batch, state_dim * n_history), jnp.float32)
    action = jax.random.normal(k_a, (batch, action_dim * 2), jnp.float32)

    out = dynamics_forward(state, action, params)
    out = jax.block_until_ready(out)

    ref = reference_forward(state, action, params)
    assert out.shape == (batch, state_dim)
    # bf16 matmul operands with f32 accumulation -> loosen tolerance vs f32 ref.
    assert jnp.allclose(out, ref, atol=5e-2, rtol=5e-2), "mismatch vs JAX reference"

    # TODO(synk): BNN branch (BayesLinear), training-mode Dropout(0.15) and the
    # MSE/KL losses are not part of the forward pass and are not implemented.
    print("KERNEL_OK")
</pallas_src>

<mosaic_0001>
module attributes {stable_mosaic.version = 11 : i64} {
  func.func @_dynamics_kernel(%arg0: i32, %arg1: memref<16x24xbf16, #tpu.memory_space<vmem>>, %arg2: memref<24x32xbf16, #tpu.memory_space<vmem>>, %arg3: memref<1x32xf32, #tpu.memory_space<vmem>>, %arg4: memref<32x32xbf16, #tpu.memory_space<vmem>>, %arg5: memref<1x32xf32, #tpu.memory_space<vmem>>, %arg6: memref<32x128xbf16, #tpu.memory_space<vmem>>, %arg7: memref<1x128xf32, #tpu.memory_space<vmem>>, %arg8: memref<16x128xf32, #tpu.memory_space<vmem>>) attributes {dimension_semantics = [#tpu.dimension_semantics<parallel>], iteration_bounds = array<i64: 1>, scalar_prefetch = 0 : i64, scratch_operands = 0 : i64, tpu.core_type = #tpu.core_type<tc>, window_params = [{transform_indices = @transform_0, window_bounds = array<i64: 16, 24>}, {pipeline_mode = #tpu.pipeline_mode<synchronous>, transform_indices = @transform_1, window_bounds = array<i64: 24, 32>}, {pipeline_mode = #tpu.pipeline_mode<synchronous>, transform_indices = @transform_2, window_bounds = array<i64: 1, 32>}, {pipeline_mode = #tpu.pipeline_mode<synchronous>, transform_indices = @transform_3, window_bounds = array<i64: 32, 32>}, {pipeline_mode = #tpu.pipeline_mode<synchronous>, transform_indices = @transform_4, window_bounds = array<i64: 1, 32>}, {pipeline_mode = #tpu.pipeline_mode<synchronous>, transform_indices = @transform_5, window_bounds = array<i64: 32, 128>}, {pipeline_mode = #tpu.pipeline_mode<synchronous>, transform_indices = @transform_6, window_bounds = array<i64: 1, 128>}, {transform_indices = @transform_7, window_bounds = array<i64: 16, 128>}]} {
    %c0 = arith.constant 0 : index
    %c0_0 = arith.constant 0 : index
    %0 = vector.load %arg1[%c0, %c0_0] : memref<16x24xbf16, #tpu.memory_space<vmem>>, vector<16x24xbf16>
    %c0_1 = arith.constant 0 : index
    %c0_2 = arith.constant 0 : index
    %1 = vector.load %arg2[%c0_1, %c0_2] : memref<24x32xbf16, #tpu.memory_space<vmem>>, vector<24x32xbf16>
    %cst = arith.constant dense<0.000000e+00> : vector<16x32xf32>
    %2 = tpu.matmul %0, %1, %cst {dimension_numbers = #tpu.dot_dimension_numbers<[1], [0], [0], [1], [0, 0, 1, 1], [], []>} : vector<16x24xbf16>, vector<24x32xbf16>, vector<16x32xf32> -> vector<16x32xf32>
    %c0_3 = arith.constant 0 : index
    %c0_4 = arith.constant 0 : index
    %3 = vector.load %arg3[%c0_3, %c0_4] : memref<1x32xf32, #tpu.memory_space<vmem>>, vector<1x32xf32>
    %4 = vector.broadcast %3 : vector<1x32xf32> to vector<16x32xf32>
    %5 = arith.addf %2, %4 : vector<16x32xf32>
    %cst_5 = arith.constant 0.000000e+00 : f32
    %6 = vector.broadcast %cst_5 : f32 to vector<16x32xf32>
    %7 = arith.maximumf %5, %6 : vector<16x32xf32>
    %8 = arith.truncf %7 : vector<16x32xf32> to vector<16x32xbf16>
    %c0_6 = arith.constant 0 : index
    %c0_7 = arith.constant 0 : index
    %9 = vector.load %arg4[%c0_6, %c0_7] : memref<32x32xbf16, #tpu.memory_space<vmem>>, vector<32x32xbf16>
    %cst_8 = arith.constant dense<0.000000e+00> : vector<16x32xf32>
    %10 = tpu.matmul %8, %9, %cst_8 {dimension_numbers = #tpu.dot_dimension_numbers<[1], [0], [0], [1], [0, 0, 1, 1], [], []>} : vector<16x32xbf16>, vector<32x32xbf16>, vector<16x32xf32> -> vector<16x32xf32>
    %c0_9 = arith.constant 0 : index
    %c0_10 = arith.constant 0 : index
    %11 = vector.load %arg5[%c0_9, %c0_10] : memref<1x32xf32, #tpu.memory_space<vmem>>, vector<1x32xf32>
    %12 = vector.broadcast %11 : vector<1x32xf32> to vector<16x32xf32>
    %13 = arith.addf %10, %12 : vector<16x32xf32>
    %cst_11 = arith.constant 0.000000e+00 : f32
    %14 = vector.broadcast %cst_11 : f32 to vector<16x32xf32>
    %15 = arith.maximumf %13, %14 : vector<16x32xf32>
    %16 = arith.truncf %15 : vector<16x32xf32> to vector<16x32xbf16>
    %c0_12 = arith.constant 0 : index
    %c0_13 = arith.constant 0 : index
    %17 = vector.load %arg6[%c0_12, %c0_13] : memref<32x128xbf16, #tpu.memory_space<vmem>>, vector<32x128xbf16>
    %cst_14 = arith.constant dense<0.000000e+00> : vector<16x128xf32>
    %18 = tpu.matmul %16, %17, %cst_14 {dimension_numbers = #tpu.dot_dimension_numbers<[1], [0], [0], [1], [0, 0, 1, 1], [], []>} : vector<16x32xbf16>, vector<32x128xbf16>, vector<16x128xf32> -> vector<16x128xf32>
    %c0_15 = arith.constant 0 : index
    %c0_16 = arith.constant 0 : index
    %19 = vector.load %arg7[%c0_15, %c0_16] : memref<1x128xf32, #tpu.memory_space<vmem>>, vector<1x128xf32>
    %20 = vector.broadcast %19 : vector<1x128xf32> to vector<16x128xf32>
    %21 = arith.addf %18, %20 : vector<16x128xf32>
    %c0_17 = arith.constant 0 : index
    %c0_18 = arith.constant 0 : index
    %22 = vector.load %arg8[%c0_17, %c0_18] : memref<16x128xf32, #tpu.memory_space<vmem>>, vector<16x128xf32>
    tpu.vector_store %arg8[%c0_17, %c0_18], %21 {strides = array<i32>} : memref<16x128xf32, #tpu.memory_space<vmem>>, vector<16x128xf32>,
    return
  }
  func.func @transform_0(%arg0: i32) -> (i32, i32) {
    %c0_i32 = arith.constant 0 : i32
    %c0_i32_0 = arith.constant 0 : i32
    return %arg0, %c0_i32 : i32, i32
  }
  func.func @transform_1(%arg0: i32) -> (i32, i32) {
    %c0_i32 = arith.constant 0 : i32
    %c0_i32_0 = arith.constant 0 : i32
    %c0_i32_1 = arith.constant 0 : i32
    return %c0_i32, %c0_i32_0 : i32, i32
  }
  func.func @transform_2(%arg0: i32) -> (i32, i32) {
    %c0_i32 = arith.constant 0 : i32
    %c0_i32_0 = arith.constant 0 : i32
    %c0_i32_1 = arith.constant 0 : i32
    return %c0_i32, %c0_i32_0 : i32, i32
  }
  func.func @transform_3(%arg0: i32) -> (i32, i32) {
    %c0_i32 = arith.constant 0 : i32
    %c0_i32_0 = arith.constant 0 : i32
    %c0_i32_1 = arith.constant 0 : i32
    return %c0_i32, %c0_i32_0 : i32, i32
  }
  func.func @transform_4(%arg0: i32) -> (i32, i32) {
    %c0_i32 = arith.constant 0 : i32
    %c0_i32_0 = arith.constant 0 : i32
    %c0_i32_1 = arith.constant 0 : i32
    return %c0_i32, %c0_i32_0 : i32, i32
  }
  func.func @transform_5(%arg0: i32) -> (i32, i32) {
    %c0_i32 = arith.constant 0 : i32
    %c0_i32_0 = arith.constant 0 : i32
    %c0_i32_1 = arith.constant 0 : i32
    return %c0_i32, %c0_i32_0 : i32, i32
  }
  func.func @transform_6(%arg0: i32) -> (i32, i32) {
    %c0_i32 = arith.constant 0 : i32
    %c0_i32_0 = arith.constant 0 : i32
    %c0_i32_1 = arith.constant 0 : i32
    return %c0_i32, %c0_i32_0 : i32, i32
  }
  func.func @transform_7(%arg0: i32) -> (i32, i32) {
    %c0_i32 = arith.constant 0 : i32
    %c0_i32_0 = arith.constant 0 : i32
    return %arg0, %c0_i32 : i32, i32
  }
}

</mosaic_0001>

<bundles_post_ra>
// kernel: tpu_custom_call.1
= control target key start
LH: loop header
LB: loop body
LE: loop exit
PB: predicated region body
PF: predicated region fallthrough
CT: control target
= control target key end

     0   :  { %12 = vsyncpa [#allocation3], 0  ;;  %s593_s0 = inlined_call_operand.hbm [shape: bf16[16,24], index: 0, kind: input, shape index: {}]   ;;  %s594_s1 = inlined_call_operand.hbm [shape: bf16[24,32], index: 1, kind: input, shape index: {}]   ;;  %s595_s2 = inlined_call_operand.vmem [shape: f32[1,32], index: 2, kind: input, shape index: {}]   ;;  %s596_s3 = inlined_call_operand.hbm [shape: bf16[32,32], index: 3, kind: input, shape index: {}]   ;;  %s597_s4 = inlined_call_operand.vmem [shape: f32[1,32], index: 4, kind: input, shape index: {}]   ;;  %s598_s5 = inlined_call_operand.vmem [shape: bf16[32,128], index: 5, kind: input, shape index: {}]   ;;  %s599_s6 = inlined_call_operand.vmem [shape: f32[1,128], index: 6, kind: input, shape index: {}]   ;;  %s600_s7 = inlined_call_operand.hbm [shape: f32[16,128], index: 7, kind: output, shape index: {}]  }
   0x1   :  { %13 = vsyncpa [#allocation6], 0 }
   0x2   :  { %14 = vsyncpa [#allocation4], 0  ;;  %s462_s24 = smov [#allocation5]   ;;  %s463_s26 = smov [#allocation2]  }
   0x3   :  { %s32_s25 = sshll.u32 %s462_s24, 4  ;;  %s20_s27 = sshll.u32 %s463_s26, 4  ;;  %s33_s25 = int_to_ptr.vmem [resolvable:$true] %s32_s25  ;;  %s512_s27 = int_to_ptr.vmem [resolvable:$true] %s20_s27 }
   0x4   :  { %s368_s30 = scalar_lea.hbm %s594_s1, 192 }
   0x5   :  { %p369_p0 = scmp.ne.s32.totalorder %s594_s1, %s368_s30  ;;  %p372_p1 = scmp.lt.u32.totalorder %s368_s30, %s594_s1 }
   0x7   :  { %p374_p2 = pnand %p372_p1, %p369_p0 }
   0x9   :  { %377 = shalt.err (!%p374_p2)
}
   0xa   :  { %s378_s12 = scalar_lea.vmem %s33_s25, 192  ;;  %p383_p4 = scmp.lt.s32.totalorder %s33_s25, %s33_s25 }
   0xb   :  { %p379_p3 = scmp.ne.s32.totalorder %s33_s25, %s378_s12  ;;  %p384_p5 = scmp.lt.s32.totalorder %s378_s12, %s378_s12 }
   0xd   :  { %p385_p6 = por %p384_p5, %p383_p4 }
   0xf   :  { %p386_p7 = pnand %p385_p6, %p379_p3 }
  0x11   :  { %389 = shalt.err (!%p386_p7)
}
  0x12   :  { %s464_s13 = smov 64   ;;  %s465_s14 = smov 4  }
  0x13   :  { %38 = dma.hbm_to_vmem [thread:$0]  %s594_s1, 192, %s33_s25, [#allocation6], %s464_s13, %s464_s13, %s465_s14  }
  0x14   :  { %s390_s19 = scalar_lea.hbm %s593_s0, 128 }
  0x15   :  { %p391_p8 = scmp.ne.s32.totalorder %s593_s0, %s390_s19  ;;  %p394_p9 = scmp.lt.u32.totalorder %s390_s19, %s593_s0 }
  0x17   :  { %p396_p10 = pnand %p394_p9, %p391_p8 }
  0x19   :  { %399 = shalt.err (!%p396_p10)
}
  0x1a   :  { %s400_s24 = scalar_lea.vmem %s512_s27, 128  ;;  %p405_p12 = scmp.lt.s32.totalorder %s512_s27, %s512_s27 }
  0x1b   :  { %p401_p11 = scmp.ne.s32.totalorder %s512_s27, %s400_s24  ;;  %p406_p13 = scmp.lt.s32.totalorder %s400_s24, %s400_s24 }
  0x1d   :  { %p407_p0 = por %p406_p13, %p405_p12 }
  0x1f   :  { %p408_p1 = pnand %p407_p0, %p401_p11 }
  0x21   :  { %411 = shalt.err (!%p408_p1)
}
  0x22   :  { %26 = dma.hbm_to_vmem [thread:$0]  %s593_s0, 128, %s512_s27, [#allocation3], %s464_s13, %s464_s13, %s465_s14  }
  0x23   :  { %s466_s26 = smov [#allocation7]   ;;  %s412_s8 = scalar_lea.hbm %s596_s3, 256 }
  0x24   :  { %s46_s28 = sshll.u32 %s466_s26, 4  ;;  %p413_p2 = scmp.ne.s32.totalorder %s596_s3, %s412_s8  ;;  %s47_s28 = int_to_ptr.vmem [resolvable:$true] %s46_s28 }
  0x25   :  { %p416_p3 = scmp.lt.u32.totalorder %s412_s8, %s596_s3 }
  0x27   :  { %p418_p4 = pnand %p416_p3, %p413_p2 }
  0x29   :  { %421 = shalt.err (!%p418_p4)
}
  0x2a   :  { %s422_s15 = scalar_lea.vmem %s47_s28, 256  ;;  %p427_p6 = scmp.lt.s32.totalorder %s47_s28, %s47_s28 }
  0x2b   :  { %p423_p5 = scmp.ne.s32.totalorder %s47_s28, %s422_s15  ;;  %p428_p7 = scmp.lt.s32.totalorder %s422_s15, %s422_s15 }
  0x2d   :  { %p429_p8 = por %p428_p7, %p427_p6 }
  0x2f   :  { %p430_p9 = pnand %p429_p8, %p423_p5 }
  0x31   :  { %433 = shalt.err (!%p430_p9)
}
  0x32   :  { %52 = dma.hbm_to_vmem [thread:$0]  %s596_s3, 256, %s47_s28, [#allocation6], %s464_s13, %s464_s13, %s465_s14  }
  0x33   :  { %456 = dma.done.wait [#allocation3], 128  }
  0x34   :  { %457 = vsyncadd [#allocation3], 4294967168 }
  0x35   :  { %458 = dma.done.wait [#allocation6], 448  }
  0x36   :  { %459 = vsyncadd [#allocation6], 4294966848  ;;  %v467_v0 = vmov 0.0   ;;  %vm468_vm0 = vmmov 0   ;;  %v361_v1 = vld [vmem:[#allocation5] sm:$0xff]   ;;  %vm99_vm1 = vcmask 1043456  }
  0x37   :  { %327 = vmatprep.subr.bf16.mxu0 %v467_v0  ;;  %331 = vmatprep.mubr.msk.bf16.mxu0 %vm468_vm0, %v467_v0  ;;  %v362_v2 = vld [vmem:[#allocation5 + $0x8] ss:$0 sps:$4 sm:$0xff]   ;;  %v363_v4 = vld [vmem:[#allocation2] sm:$0xff]   ;;  %vm95_vm2 = vcmask 195584   ;;  %v364_v5 = vld [vmem:[#allocation7] sm:$0xff]   ;;  %vm170_vm3 = vcmask 261120  }
  0x38   :  { %335 = vmatprep.subr.bf16.mxu1 %v467_v0  ;;  %339 = vmatprep.mubr.msk.bf16.mxu1 %vm468_vm0, %v467_v0  ;;  %v101_v3 = vsel %vm99_vm1, %v362_v2, 0  ;;  %v365_v6 = vld [vmem:[#allocation7 + $0x8] sm:$0xff]   ;;  %v305_v7 = vld [vmem:[%s595_s2] ss:$0 sm:$0xff] }
  0x39   :  { %328 = vmatpush3.bf16.msra.mxu0 %v361_v1  ;;  %336 = vmatpush3.bf16.msra.mxu1 %v364_v5  ;;  %v366_v17 = vld [vmem:[%s598_s5] sm:$0xff]   ;;  %v367_v18 = vld [vmem:[%s598_s5 + $0x8] sm:$0xff]   ;;  %s469_s5 = smov [#allocation8]  }
  0x3a   :  { %329 = vmatprep.subr.bf16.mxu0 %v467_v0  ;;  %337 = vmatprep.subr.bf16.mxu1 %v467_v0  ;;  %v310_v19 = vld [vmem:[%s597_s4] ss:$0 sm:$0xff]  ;;  %s292_s22 = sshll.u32 %s469_s5, 4  ;;  %s293_s22 = int_to_ptr.vmem [resolvable:$true] %s292_s22 }
  0x3b   :  { %v314_v29 = vld [vmem:[%s599_s6] ss:$0 sm:$0xff]  ;;  %s434_s4 = scalar_lea.vmem %s293_s22, 256  ;;  %p439_p11 = scmp.lt.s32.totalorder %s293_s22, %s293_s22 }
  0x3c   :  { %p435_p10 = scmp.ne.s32.totalorder %s293_s22, %s434_s4  ;;  %p440_p12 = scmp.lt.s32.totalorder %s434_s4, %s434_s4 }
  0x3d   :  { %330 = vmatpush3.bf16.msra.mxu0 %v101_v3  ;;  %338 = vmatpush3.bf16.msra.mxu1 %v365_v6 }
  0x3e   :  { %343 = vmatprep.subr.bf16.mxu0 %v467_v0  ;;  %p441_p13 = por %p440_p12, %p439_p11 }
  0x40   :  { %332 = vmatmul.mubr.msk.bf16.vlgmr.msra.gmra.mrb[0].mxu0 %vm95_vm2, %v363_v4  ;;  %p442_p0 = pnand %p441_p13, %p435_p10 }
  0x41   :  { %347 = vmatprep.mubr.msk.bf16.mxu0 %vm468_vm0, %v467_v0  ;;  %344 = vmatpush3.bf16.msra.mxu0 %v366_v17 }
  0x42   :  { %345 = vmatprep.subr.bf16.mxu0 %v467_v0 }
  0x45   :  { %346 = vmatpush3.bf16.msra.mxu0 %v367_v18 }
 0x113   :  { %v137_v8 = vpop.f32.mrb[0].mxu0 }
 0x114   :  { %v138_v9 = vadd.f32 %v305_v7, %v137_v8  ;;  %v333_v10 = vpop.f32.mrb[1].mxu0 }
 0x115   :  { %v140_v11 = vpop.f32.mrb[2].mxu0 }
 0x116   :  { %v141_v12 = vadd.f32 %v305_v7, %v140_v11  ;;  %v334_v13 = vpop.f32.mrb[3].mxu0  ;;  %v144_v14 = vmax.f32 %v138_v9, 0.0 }
 0x118   :  { %v145_v15 = vmax.f32 %v141_v12, 0.0 }
 0x11a   :  { %v146_v16 = vpack.c.bf16 %v145_v15, %v144_v14 }
 0x11c   :  { %340 = vmatmul.mubr.msk.bf16.vlgmr.msra.gmra.mrb[0].mxu1 %vm170_vm3, %v146_v16 }
 0x1ef   :  { %v208_v20 = vpop.f32.mrb[0].mxu1 }
 0x1f0   :  { %v209_v21 = vadd.f32 %v310_v19, %v208_v20  ;;  %v341_v22 = vpop.f32.mrb[1].mxu1 }
 0x1f1   :  { %v211_v23 = vpop.f32.mrb[2].mxu1 }
 0x1f2   :  { %v212_v24 = vadd.f32 %v310_v19, %v211_v23  ;;  %v342_v25 = vpop.f32.mrb[3].mxu1  ;;  %v215_v26 = vmax.f32 %v209_v21, 0.0 }
 0x1f4   :  { %v216_v27 = vmax.f32 %v212_v24, 0.0 }
 0x1f6   :  { %v217_v28 = vpack.c.bf16 %v216_v27, %v215_v26 }
 0x1f8   :  { %348 = vmatmul.mubr.msk.bf16.vlgmr.msra.gmra.mrb[4].mxu0 %vm170_vm3, %v217_v28 }
 0x2cb   :  { %v278_v30 = vpop.f32.mrb[4].mxu0 }
 0x2cc   :  { %v279_v31 = vadd.f32 %v314_v29, %v278_v30  ;;  %v349_v32 = vpop.f32.mrb[5].mxu0 }
 0x2cd   :  { %v281_v33 = vpop.f32.mrb[6].mxu0 }
 0x2ce   :  { %285 = vst [vmem:[#allocation8] sm:$0xff] %v279_v31  ;;  %v282_v34 = vadd.f32 %v314_v29, %v281_v33  ;;  %v350_v35 = vpop.f32.mrb[7].mxu0 }
 0x2d0   :  { %286 = vst [vmem:[#allocation8 + $0x8] sm:$0xff] %v282_v34 }
 0x2d1   :  { %445 = shalt.err (!%p442_p0)
}
 0x2d2   :  { %s446_s24 = scalar_lea.hbm %s600_s7, 256 }
 0x2d3   :  { %p447_p1 = scmp.ne.s32.totalorder %s600_s7, %s446_s24  ;;  %p450_p2 = scmp.lt.u32.totalorder %s446_s24, %s600_s7 }
 0x2d5   :  { %p452_p3 = pnand %p450_p2, %p447_p1 }
 0x2d7   :  { %455 = shalt.err (!%p452_p3)
}
 0x2d8   :  { %s470_s29 = smov 128   ;;  %s471_s30 = smov 8  }
 0x2d9   :  { %298 = dma.vmem_to_hbm [thread:$0]  %s293_s22, 256, %s600_s7, [#allocation4], %s470_s29, %s470_s29, %s471_s30  }
 0x2da   :  { %460 = dma.done.wait [#allocation4], 256  }
 0x2db   :  { %461 = vsyncadd [#allocation4], 4294967040 }
 0x2dc   :  { %302 = vsyncpa [#allocation3], 1 }
 0x2dd   :  { %303 = vsyncpa [#allocation6], 1 }
 0x2de   :  { %304 = vsyncpa [#allocation4], 1 }

</bundles_post_ra>
